<compile_context>
chip_gen: v7x
topology: tpu7x:2x2x1
jax: 0.10.0
libtpu: 0.0.40
codegen_flags: <defaults>
</compile_context>

<pallas_src>
import functools
import math

import jax
import jax.numpy as jnp
from jax.experimental import pallas as pl
from jax.experimental.pallas import tpu as pltpu

_LANE = 128
_SUBLANE = 8


def _round_up(x, m):
    return ((x + m - 1) // m) * m


def _softplus(x):
    # Matches torch.nn.Softplus(beta=1, threshold=20)
    return jnp.where(x > 20.0, x, jnp.log1p(jnp.exp(jnp.minimum(x, 20.0))))


def _fused_odenet_kernel(x_ref, w0_ref, brest_ref, *rest, out_ps):
    """refs = (x, W0big, b_rest, W_1..W_{L-1}, out).

    x:      (TM, xin_p)                 packed [y | context | 1 | 0...]
    W0big:  (xin_p, out_p0 + 2*sum_i out_p_i)
            columns = [layer-0 Linear (+bias row) | per layer: gate-pre | hyper-bias]
    b_rest: (1, sum_{i>=1} out_p_i)     main-path biases of layers >= 1 (f32)
    W_i:    (out_p_{i-1}, out_p_i)      main-path weights of layers >= 1
    """
    o_ref = rest[-1]
    w_refs = rest[:-1]
    n_layers = len(out_ps)

    # One big matmul: layer-0 main path + every layer's hyper path.
    z = jnp.dot(x_ref[...].astype(w0_ref.dtype), w0_ref[...],
                preferred_element_type=jnp.float32)

    # Precompute all gates / hyper-biases up front.  They depend only on the context so
    # this work sits OFF the serial layer->layer chain and overlaps with the MXU matmuls.
    # Main biases of layers >= 1 are folded here: (h@W + b)*g + hb == (h@W)*g + (b*g + hb).
    gates, hbiases = [], []
    off = out_ps[0]
    b_off = 0
    for i in range(n_layers):
        op = out_ps[i]
        g = jax.nn.sigmoid(z[:, off:off + op])          # gate bias already folded in W0big
        off += op
        hb = z[:, off:off + op]
        off += op
        if i > 0:
            hb = hb + brest_ref[:, b_off:b_off + op] * g
            b_off += op
        gates.append(g)
        hbiases.append(hb)

    # Layer 0 (its Linear + bias is already part of z).
    h = z[:, :out_ps[0]] * gates[0] + hbiases[0]
    if n_layers > 1:
        h = _softplus(h)

    # Layers 1..L-1: one matmul + mul + add each on the serial chain.
    for i in range(1, n_layers):
        w_ref = w_refs[i - 1]
        lin = jnp.dot(h.astype(w_ref.dtype), w_ref[...],
                      preferred_element_type=jnp.float32)
        h = lin * gates[i] + hbiases[i]
        if i < n_layers - 1:
            h = _softplus(h)

    o_ref[...] = h.astype(o_ref.dtype)


def init_odenet_params(key, latent_dim, hidden_dims, context_dims):
    """Raw (unpadded) params, per layer: (W (in,out), b (out,), Wg (C,out), bg (out,), Wb (C,out)).
    Init mimics torch.nn.Linear (uniform +/- 1/sqrt(fan_in)); weights stored as (in, out)."""
    params = []
    in_dim = latent_dim
    for dim in list(hidden_dims) + [latent_dim]:
        key, k1, k2, k3, k4, k5 = jax.random.split(key, 6)
        bw = 1.0 / math.sqrt(in_dim)
        bc = 1.0 / math.sqrt(max(context_dims, 1))
        w = jax.random.uniform(k1, (in_dim, dim), jnp.float32, -bw, bw)
        b = jax.random.uniform(k2, (dim,), jnp.float32, -bw, bw)
        wg = jax.random.uniform(k3, (context_dims, dim), jnp.float32, -bc, bc)
        bg = jax.random.uniform(k4, (dim,), jnp.float32, -bc, bc)
        wb = jax.random.uniform(k5, (context_dims, dim), jnp.float32, -bc, bc)  # bias=False
        params.append((w, b, wg, bg, wb))
        in_dim = dim
    return params


def pack_odenet_params(params, weight_dtype=jnp.bfloat16):
    """Pack/pad params for the fused kernel.

    * Every feature/context dim is zero-padded to a multiple of 128 (lane-dense, MXU
      tile aligned).
    * Layer-0 main weight (+ bias row) and all layers' hyper weights (gate bias folded
      as a row hit by the constant-1 input column) are concatenated column-wise into
      one matrix W0big, consumed by a single matmul.
    * weight_dtype=jnp.bfloat16 (default) halves weight bytes and doubles+ MXU
      throughput on v6e/v7x; pass jnp.float32 for bit-accurate f32.
    """
    in_dim = params[0][0].shape[0]
    ctx_dim = params[0][2].shape[0]
    out_dims = [w.shape[1] for (w, _, _, _, _) in params]
    out_ps = [_round_up(d, _LANE) for d in out_dims]
    n_layers = len(params)

    xin = in_dim + ctx_dim + 1                 # [y | context | 1]
    xin_p = _round_up(xin, _LANE)
    c0 = in_dim                                # first context row
    bias_row = in_dim + ctx_dim                # constant-1 row

    total_cols = out_ps[0] + 2 * sum(out_ps)
    w0 = jnp.zeros((xin_p, total_cols), jnp.float32)

    # Layer-0 main path: y @ W0 + b0 (bias via the constant-1 column).
    w0 = w0.at[:in_dim, :out_dims[0]].set(params[0][0])
    w0 = w0.at[bias_row, :out_dims[0]].set(params[0][1])

    # All layers' hyper paths: [gate-pre | hyper-bias] per layer.
    off = out_ps[0]
    for i, (_, _, wg, bg, wb) in enumerate(params):
        d = out_dims[i]
        w0 = w0.at[c0:c0 + ctx_dim, off:off + d].set(wg)
        w0 = w0.at[bias_row, off:off + d].set(bg)
        off += out_ps[i]
        w0 = w0.at[c0:c0 + ctx_dim, off:off + d].set(wb)   # HyperBias has no bias
        off += out_ps[i]

    # Concatenated main-path biases of layers >= 1 (kept f32; folded as b*gate + hbias).
    rest_width = sum(out_ps[1:])
    brest = jnp.zeros((1, max(rest_width, _LANE)), jnp.float32)
    b_off = 0
    for i in range(1, n_layers):
        brest = brest.at[0, b_off:b_off + out_dims[i]].set(params[i][1])
        b_off += out_ps[i]

    # Per-layer main weights for layers >= 1 (rows for padded input columns stay zero,
    # so softplus(0)=0.693 garbage in padded activation columns never contaminates).
    w_rest = []
    for i in range(1, n_layers):
        wi = jnp.zeros((out_ps[i - 1], out_ps[i]), jnp.float32)
        wi = wi.at[:out_dims[i - 1], :out_dims[i]].set(params[i][0])
        w_rest.append(wi.astype(weight_dtype))

    return {
        "w0": w0.astype(weight_dtype),
        "brest": brest,
        "w_rest": tuple(w_rest),
        "out_ps": tuple(out_ps),
        "out_dims": tuple(out_dims),
        "in_dim": in_dim,
        "ctx_dim": ctx_dim,
        "xin_p": xin_p,
    }


def pack_odenet_inputs(y, context, packed, *, batch_tile=512):
    """Build the fused activation slab x = [y | context | 1 | 0...], batch padded to the tile.

    In an ODE hot loop with a fixed context, build this once outside the solver loop and
    only refresh the y columns (avoids a full extra HBM read+write per RHS evaluation).
    """
    batch = y.shape[0]
    in_dim, ctx_dim, xin_p = packed["in_dim"], packed["ctx_dim"], packed["xin_p"]
    tm = min(batch_tile, _round_up(batch, _SUBLANE))
    b_pad = _round_up(batch, tm)

    x = jnp.zeros((b_pad, xin_p), jnp.float32)
    x = x.at[:batch, :in_dim].set(y.astype(jnp.float32))
    if ctx_dim:
        x = x.at[:batch, in_dim:in_dim + ctx_dim].set(context.astype(jnp.float32))
    x = x.at[:batch, in_dim + ctx_dim].set(1.0)
    return x, tm


def odenet_apply(x, packed, *, tm, out_dtype=jnp.float32, vmem_limit_bytes=None):
    """Run the fused ODEnet kernel on a pre-packed activation slab."""
    b_pad, xin_p = x.shape
    out_ps = packed["out_ps"]
    out_p = out_ps[-1]
    grid = (b_pad // tm,)

    weights = (packed["w0"], packed["brest"]) + packed["w_rest"]

    # Activations tiled over the batch grid; weights get a constant block index so Pallas
    # DMAs them once and keeps them resident in VMEM across grid steps.
    in_specs = [pl.BlockSpec((tm, xin_p), lambda i: (i, 0))]
    for arr in weights:
        in_specs.append(pl.BlockSpec(arr.shape, lambda i: (0, 0)))
    out_spec = pl.BlockSpec((tm, out_p), lambda i: (i, 0))

    kernel = functools.partial(_fused_odenet_kernel, out_ps=out_ps)

    # Rough VMEM footprint (pipeline double-buffers every input); only raise the scoped
    # limit when it actually matters so small configs keep compiler defaults.
    # TODO(synk): for very large hidden dims on v7x (64 MiB VMEM) single-buffer the
    # resident weights (pipeline_mode=pl.Buffered(1)) instead of raising the limit.
    w_bytes = sum(int(a.size) * a.dtype.itemsize for a in weights) * 2
    a_bytes = (tm * xin_p + tm * out_p) * 4 * 2
    cp_kwargs = dict(dimension_semantics=("parallel",))   # megacore sharding on v7x
    if vmem_limit_bytes is None and (w_bytes + a_bytes) > (28 << 20):
        vmem_limit_bytes = min(2 * (w_bytes + a_bytes), 64 << 20)
    if vmem_limit_bytes is not None:
        cp_kwargs["vmem_limit_bytes"] = int(vmem_limit_bytes)

    return pl.pallas_call(
        kernel,
        out_shape=jax.ShapeDtypeStruct((b_pad, out_p), out_dtype),
        grid=grid,
        in_specs=in_specs,
        out_specs=out_spec,
        compiler_params=pltpu.CompilerParams(**cp_kwargs),
    )(x, *weights)


def odenet_forward(y, context, packed, *, batch_tile=512):
    """ODEnet.forward(y, context): hidden layers = ConcatSquashLinear + Softplus, last plain."""
    batch = y.shape[0]
    x, tm = pack_odenet_inputs(y, context, packed, batch_tile=batch_tile)
    out = odenet_apply(x, packed, tm=tm, out_dtype=y.dtype)
    return out[:batch, :packed["out_dims"][-1]]


if __name__ == "__main__":
    latent_dim = 4
    hidden_dims = (32, 32)
    context_dims = 8
    batch = 8

    key = jax.random.PRNGKey(0)
    k_params, k_y, k_c = jax.random.split(key, 3)

    params = init_odenet_params(k_params, latent_dim, hidden_dims, context_dims)
    y = jax.random.normal(k_y, (batch, latent_dim), jnp.float32)
    context = jax.random.normal(k_c, (batch, context_dims), jnp.float32)

    # Pure-JAX reference of the same semantics (unpadded params), with the matmul
    # operands cast to `wdt` exactly like the kernel does.
    def ref_forward(y, c, params, wdt):
        n = len(params)
        h = y
        for i, (w, b, wg, bg, wb) in enumerate(params):
            lin = jnp.dot(h.astype(wdt), w.astype(wdt),
                          preferred_element_type=jnp.float32) + b
            gate = jax.nn.sigmoid(
                jnp.dot(c.astype(wdt), wg.astype(wdt),
                        preferred_element_type=jnp.float32) + bg)
            hbias = jnp.dot(c.astype(wdt), wb.astype(wdt),
                            preferred_element_type=jnp.float32)
            h = lin * gate + hbias
            if i < n - 1:
                h = _softplus(h)
        return h

    # f32 weights: tight check.
    packed_f32 = pack_odenet_params(params, weight_dtype=jnp.float32)
    out_f32 = jax.block_until_ready(odenet_forward(y, context, packed_f32))
    ref_f32 = ref_forward(y, context, params, jnp.float32)
    assert out_f32.shape == (batch, latent_dim)
    err32 = float(jnp.max(jnp.abs(out_f32 - ref_f32)))
    assert jnp.allclose(out_f32, ref_f32, atol=5e-5, rtol=5e-5), err32

    # bf16 weights (recommended default on v6e/v7x): check against the bf16-cast reference.
    packed_bf16 = pack_odenet_params(params, weight_dtype=jnp.bfloat16)
    out_bf16 = jax.block_until_ready(odenet_forward(y, context, packed_bf16))
    ref_bf16 = ref_forward(y, context, params, jnp.bfloat16)
    err16 = float(jnp.max(jnp.abs(out_bf16 - ref_bf16)))
    assert jnp.allclose(out_bf16, ref_bf16, atol=2e-2, rtol=2e-2), err16

    print("KERNEL_OK")
</pallas_src>

<mosaic_0001>
module attributes {stable_mosaic.version = 11 : i64} {
  func.func @_fused_odenet_kernel(%arg0: i32, %arg1: memref<8x128xf32, #tpu.memory_space<vmem>>, %arg2: memref<128x896xf32, #tpu.memory_space<vmem>>, %arg3: memref<1x256xf32, #tpu.memory_space<vmem>>, %arg4: memref<128x128xf32, #tpu.memory_space<vmem>>, %arg5: memref<128x128xf32, #tpu.memory_space<vmem>>, %arg6: memref<8x128xf32, #tpu.memory_space<vmem>>) attributes {dimension_semantics = [#tpu.dimension_semantics<parallel>], iteration_bounds = array<i64: 1>, scalar_prefetch = 0 : i64, scratch_operands = 0 : i64, tpu.core_type = #tpu.core_type<tc>, window_params = [{transform_indices = @transform_0, window_bounds = array<i64: 8, 128>}, {pipeline_mode = #tpu.pipeline_mode<synchronous>, transform_indices = @transform_1, window_bounds = array<i64: 128, 896>}, {pipeline_mode = #tpu.pipeline_mode<synchronous>, transform_indices = @transform_2, window_bounds = array<i64: 1, 256>}, {pipeline_mode = #tpu.pipeline_mode<synchronous>, transform_indices = @transform_3, window_bounds = array<i64: 128, 128>}, {pipeline_mode = #tpu.pipeline_mode<synchronous>, transform_indices = @transform_4, window_bounds = array<i64: 128, 128>}, {transform_indices = @transform_5, window_bounds = array<i64: 8, 128>}]} {
    %c0 = arith.constant 0 : index
    %c0_0 = arith.constant 0 : index
    %0 = vector.load %arg1[%c0, %c0_0] : memref<8x128xf32, #tpu.memory_space<vmem>>, vector<8x128xf32>
    %c0_1 = arith.constant 0 : index
    %c0_2 = arith.constant 0 : index
    %1 = vector.load %arg2[%c0_1, %c0_2] : memref<128x896xf32, #tpu.memory_space<vmem>>, vector<128x896xf32>
    %cst = arith.constant dense<0.000000e+00> : vector<8x896xf32>
    %2 = tpu.matmul %0, %1, %cst {dimension_numbers = #tpu.dot_dimension_numbers<[1], [0], [0], [1], [0, 0, 1, 1], [], []>} : vector<8x128xf32>, vector<128x896xf32>, vector<8x896xf32> -> vector<8x896xf32>
    %3 = vector.extract_strided_slice %2 {offsets = [0, 128], sizes = [8, 128], strides = [1, 1]} : vector<8x896xf32> to vector<8x128xf32>
    %4 = arith.negf %3 : vector<8x128xf32>
    %5 = math.exp %4 : vector<8x128xf32>
    %cst_3 = arith.constant 1.000000e+00 : f32
    %6 = vector.broadcast %cst_3 : f32 to vector<8x128xf32>
    %7 = arith.addf %6, %5 : vector<8x128xf32>
    %8 = arith.divf %6, %7 : vector<8x128xf32>
    %9 = vector.extract_strided_slice %2 {offsets = [0, 256], sizes = [8, 128], strides = [1, 1]} : vector<8x896xf32> to vector<8x128xf32>
    %10 = vector.extract_strided_slice %2 {offsets = [0, 384], sizes = [8, 128], strides = [1, 1]} : vector<8x896xf32> to vector<8x128xf32>
    %11 = arith.negf %10 : vector<8x128xf32>
    %12 = math.exp %11 : vector<8x128xf32>
    %cst_4 = arith.constant 1.000000e+00 : f32
    %13 = vector.broadcast %cst_4 : f32 to vector<8x128xf32>
    %14 = arith.addf %13, %12 : vector<8x128xf32>
    %15 = arith.divf %13, %14 : vector<8x128xf32>
    %16 = vector.extract_strided_slice %2 {offsets = [0, 512], sizes = [8, 128], strides = [1, 1]} : vector<8x896xf32> to vector<8x128xf32>
    %c0_5 = arith.constant 0 : index
    %c0_6 = arith.constant 0 : index
    %17 = vector.load %arg3[%c0_5, %c0_6] : memref<1x256xf32, #tpu.memory_space<vmem>>, vector<1x128xf32>
    %18 = vector.broadcast %17 : vector<1x128xf32> to vector<8x128xf32>
    %19 = arith.mulf %18, %15 : vector<8x128xf32>
    %20 = arith.addf %16, %19 : vector<8x128xf32>
    %21 = vector.extract_strided_slice %2 {offsets = [0, 640], sizes = [8, 128], strides = [1, 1]} : vector<8x896xf32> to vector<8x128xf32>
    %22 = arith.negf %21 : vector<8x128xf32>
    %23 = math.exp %22 : vector<8x128xf32>
    %cst_7 = arith.constant 1.000000e+00 : f32
    %24 = vector.broadcast %cst_7 : f32 to vector<8x128xf32>
    %25 = arith.addf %24, %23 : vector<8x128xf32>
    %26 = arith.divf %24, %25 : vector<8x128xf32>
    %27 = vector.extract_strided_slice %2 {offsets = [0, 768], sizes = [8, 128], strides = [1, 1]} : vector<8x896xf32> to vector<8x128xf32>
    %c0_8 = arith.constant 0 : index
    %c128 = arith.constant 128 : index
    %28 = vector.load %arg3[%c0_8, %c128] : memref<1x256xf32, #tpu.memory_space<vmem>>, vector<1x128xf32>
    %29 = vector.broadcast %28 : vector<1x128xf32> to vector<8x128xf32>
    %30 = arith.mulf %29, %26 : vector<8x128xf32>
    %31 = arith.addf %27, %30 : vector<8x128xf32>
    %32 = vector.extract_strided_slice %2 {offsets = [0, 0], sizes = [8, 128], strides = [1, 1]} : vector<8x896xf32> to vector<8x128xf32>
    %33 = arith.mulf %32, %8 : vector<8x128xf32>
    %34 = arith.addf %33, %9 : vector<8x128xf32>
    %cst_9 = arith.constant 2.000000e+01 : f32
    %35 = vector.broadcast %cst_9 : f32 to vector<8x128xf32>
    %36 = arith.cmpf ogt, %34, %35 : vector<8x128xf32>
    %cst_10 = arith.constant 2.000000e+01 : f32
    %37 = vector.broadcast %cst_10 : f32 to vector<8x128xf32>
    %38 = arith.minimumf %34, %37 : vector<8x128xf32>
    %39 = math.exp %38 : vector<8x128xf32>
    %40 = math.log1p %39 : vector<8x128xf32>
    %41 = arith.select %36, %34, %40 : vector<8x128xi1>, vector<8x128xf32>
    %c0_11 = arith.constant 0 : index
    %c0_12 = arith.constant 0 : index
    %42 = vector.load %arg4[%c0_11, %c0_12] : memref<128x128xf32, #tpu.memory_space<vmem>>, vector<128x128xf32>
    %cst_13 = arith.constant dense<0.000000e+00> : vector<8x128xf32>
    %43 = tpu.matmul %41, %42, %cst_13 {dimension_numbers = #tpu.dot_dimension_numbers<[1], [0], [0], [1], [0, 0, 1, 1], [], []>} : vector<8x128xf32>, vector<128x128xf32>, vector<8x128xf32> -> vector<8x128xf32>
    %44 = arith.mulf %43, %15 : vector<8x128xf32>
    %45 = arith.addf %44, %20 : vector<8x128xf32>
    %cst_14 = arith.constant 2.000000e+01 : f32
    %46 = vector.broadcast %cst_14 : f32 to vector<8x128xf32>
    %47 = arith.cmpf ogt, %45, %46 : vector<8x128xf32>
    %cst_15 = arith.constant 2.000000e+01 : f32
    %48 = vector.broadcast %cst_15 : f32 to vector<8x128xf32>
    %49 = arith.minimumf %45, %48 : vector<8x128xf32>
    %50 = math.exp %49 : vector<8x128xf32>
    %51 = math.log1p %50 : vector<8x128xf32>
    %52 = arith.select %47, %45, %51 : vector<8x128xi1>, vector<8x128xf32>
    %c0_16 = arith.constant 0 : index
    %c0_17 = arith.constant 0 : index
    %53 = vector.load %arg5[%c0_16, %c0_17] : memref<128x128xf32, #tpu.memory_space<vmem>>, vector<128x128xf32>
    %cst_18 = arith.constant dense<0.000000e+00> : vector<8x128xf32>
    %54 = tpu.matmul %52, %53, %cst_18 {dimension_numbers = #tpu.dot_dimension_numbers<[1], [0], [0], [1], [0, 0, 1, 1], [], []>} : vector<8x128xf32>, vector<128x128xf32>, vector<8x128xf32> -> vector<8x128xf32>
    %55 = arith.mulf %54, %26 : vector<8x128xf32>
    %56 = arith.addf %55, %31 : vector<8x128xf32>
    %c0_19 = arith.constant 0 : index
    %c0_20 = arith.constant 0 : index
    %57 = vector.load %arg6[%c0_19, %c0_20] : memref<8x128xf32, #tpu.memory_space<vmem>>, vector<8x128xf32>
    tpu.vector_store %arg6[%c0_19, %c0_20], %56 {strides = array<i32>} : memref<8x128xf32, #tpu.memory_space<vmem>>, vector<8x128xf32>,
    return
  }
  func.func @transform_0(%arg0: i32) -> (i32, i32) {
    %c0_i32 = arith.constant 0 : i32
    %c0_i32_0 = arith.constant 0 : i32
    return %arg0, %c0_i32 : i32, i32
  }
  func.func @transform_1(%arg0: i32) -> (i32, i32) {
    %c0_i32 = arith.constant 0 : i32
    %c0_i32_0 = arith.constant 0 : i32
    %c0_i32_1 = arith.constant 0 : i32
    return %c0_i32, %c0_i32_0 : i32, i32
  }
  func.func @transform_2(%arg0: i32) -> (i32, i32) {
    %c0_i32 = arith.constant 0 : i32
    %c0_i32_0 = arith.constant 0 : i32
    %c0_i32_1 = arith.constant 0 : i32
    return %c0_i32, %c0_i32_0 : i32, i32
  }
  func.func @transform_3(%arg0: i32) -> (i32, i32) {
    %c0_i32 = arith.constant 0 : i32
    %c0_i32_0 = arith.constant 0 : i32
    %c0_i32_1 = arith.constant 0 : i32
    return %c0_i32, %c0_i32_0 : i32, i32
  }
  func.func @transform_4(%arg0: i32) -> (i32, i32) {
    %c0_i32 = arith.constant 0 : i32
    %c0_i32_0 = arith.constant 0 : i32
    %c0_i32_1 = arith.constant 0 : i32
    return %c0_i32, %c0_i32_0 : i32, i32
  }
  func.func @transform_5(%arg0: i32) -> (i32, i32) {
    %c0_i32 = arith.constant 0 : i32
    %c0_i32_0 = arith.constant 0 : i32
    return %arg0, %c0_i32 : i32, i32
  }
}

</mosaic_0001>

<bundles_post_ra>
// kernel: tpu_custom_call.1
= control target key start
LH: loop header
LB: loop body
LE: loop exit
PB: predicated region body
PF: predicated region fallthrough
CT: control target
= control target key end

     0   :  { %10 = vsyncpa [#allocation3], 0  ;;  %s1370_s0 = inlined_call_operand.hbm [shape: f32[8,128], index: 0, kind: input, shape index: {}]   ;;  %s1371_s1 = inlined_call_operand.hbm [shape: f32[128,896], index: 1, kind: input, shape index: {}]   ;;  %s1372_s2 = inlined_call_operand.vmem [shape: f32[1,256], index: 2, kind: input, shape index: {}]   ;;  %s1373_s3 = inlined_call_operand.hbm [shape: f32[128,128], index: 3, kind: input, shape index: {}]   ;;  %s1374_s4 = inlined_call_operand.hbm [shape: f32[128,128], index: 4, kind: input, shape index: {}]   ;;  %s1375_s5 = inlined_call_operand.hbm [shape: f32[8,128], index: 5, kind: output, shape index: {}]  }
   0x1   :  { %11 = vsyncpa [#allocation6], 0 }
   0x2   :  { %12 = vsyncpa [#allocation9], 0 }
   0x3   :  { %13 = vsyncpa [#allocation4], 0  ;;  %s1209_s18 = smov [#allocation5]   ;;  %s1091_s22 = scalar_lea.hbm %s1371_s1, 14336 }
   0x4   :  { %s29_s19 = sshll.u32 %s1209_s18, 4  ;;  %p1092_p0 = scmp.ne.s32.totalorder %s1371_s1, %s1091_s22  ;;  %s30_s19 = int_to_ptr.vmem [resolvable:$true] %s29_s19 }
   0x5   :  { %p1095_p1 = scmp.lt.u32.totalorder %s1091_s22, %s1371_s1 }
   0x7   :  { %p1097_p2 = pnand %p1095_p1, %p1092_p0 }
   0x9   :  { %1100 = shalt.err (!%p1097_p2)
}
   0xa   :  { %s1101_s27 = scalar_lea.vmem %s30_s19, 14336  ;;  %p1106_p4 = scmp.lt.s32.totalorder %s30_s19, %s30_s19 }
   0xb   :  { %p1102_p3 = scmp.ne.s32.totalorder %s30_s19, %s1101_s27  ;;  %p1107_p5 = scmp.lt.s32.totalorder %s1101_s27, %s1101_s27 }
   0xd   :  { %p1108_p6 = por %p1107_p5, %p1106_p4 }
   0xf   :  { %p1109_p7 = pnand %p1108_p6, %p1102_p3 }
  0x11   :  { %1112 = shalt.err (!%p1109_p7)
}
  0x12   :  { %s1210_s28 = smov 896   ;;  %s1211_s29 = smov 56  }
  0x13   :  { %35 = dma.hbm_to_vmem [thread:$0]  %s1371_s1, 14336, %s30_s19, [#allocation6], %s1210_s28, %s1210_s28, %s1211_s29  }
  0x14   :  { %s1212_s7 = smov [#allocation2]   ;;  %s1213_s9 = smov [#allocation7]  }
  0x15   :  { %s20_s8 = sshll.u32 %s1212_s7, 4  ;;  %s43_s10 = sshll.u32 %s1213_s9, 4  ;;  %s21_s8 = int_to_ptr.vmem [resolvable:$true] %s20_s8  ;;  %s44_s10 = int_to_ptr.vmem [resolvable:$true] %s43_s10 }
  0x16   :  { %s1113_s13 = scalar_lea.hbm %s1370_s0, 128 }
  0x17   :  { %p1114_p8 = scmp.ne.s32.totalorder %s1370_s0, %s1113_s13  ;;  %p1117_p9 = scmp.lt.u32.totalorder %s1113_s13, %s1370_s0 }
  0x19   :  { %p1119_p10 = pnand %p1117_p9, %p1114_p8 }
  0x1b   :  { %1122 = shalt.err (!%p1119_p10)
}
  0x1c   :  { %s1123_s1 = scalar_lea.vmem %s21_s8, 128  ;;  %p1128_p12 = scmp.lt.s32.totalorder %s21_s8, %s21_s8 }
  0x1d   :  { %p1124_p11 = scmp.ne.s32.totalorder %s21_s8, %s1123_s1  ;;  %p1129_p13 = scmp.lt.s32.totalorder %s1123_s1, %s1123_s1 }
  0x1f   :  { %p1130_p0 = por %p1129_p13, %p1128_p12 }
  0x21   :  { %p1131_p1 = pnand %p1130_p0, %p1124_p11 }
  0x23   :  { %1134 = shalt.err (!%p1131_p1)
}
  0x24   :  { %23 = dma.hbm_to_vmem [thread:$0]  %s1370_s0, 128, %s21_s8, [#allocation3]  }
  0x25   :  { %s1135_s22 = scalar_lea.hbm %s1373_s3, 2048 }
  0x26   :  { %p1136_p2 = scmp.ne.s32.totalorder %s1373_s3, %s1135_s22  ;;  %p1139_p3 = scmp.lt.u32.totalorder %s1135_s22, %s1373_s3 }
  0x28   :  { %p1141_p4 = pnand %p1139_p3, %p1136_p2 }
  0x2a   :  { %1144 = shalt.err (!%p1141_p4)
}
  0x2b   :  { %s1145_s27 = scalar_lea.vmem %s44_s10, 2048  ;;  %p1150_p6 = scmp.lt.s32.totalorder %s44_s10, %s44_s10 }
  0x2c   :  { %p1146_p5 = scmp.ne.s32.totalorder %s44_s10, %s1145_s27  ;;  %p1151_p7 = scmp.lt.s32.totalorder %s1145_s27, %s1145_s27 }
  0x2e   :  { %p1152_p8 = por %p1151_p7, %p1150_p6 }
  0x30   :  { %p1153_p9 = pnand %p1152_p8, %p1146_p5 }
  0x32   :  { %1156 = shalt.err (!%p1153_p9)
}
  0x33   :  { %s1214_s0 = smov 128   ;;  %s1215_s28 = smov 8  }
  0x34   :  { %49 = dma.hbm_to_vmem [thread:$0]  %s1373_s3, 2048, %s44_s10, [#allocation6], %s1214_s0, %s1214_s0, %s1215_s28  }
  0x35   :  { %s1216_s6 = smov [#allocation8]   ;;  %s1157_s11 = scalar_lea.hbm %s1374_s4, 2048 }
  0x36   :  { %s55_s7 = sshll.u32 %s1216_s6, 4  ;;  %p1158_p10 = scmp.ne.s32.totalorder %s1374_s4, %s1157_s11  ;;  %s56_s7 = int_to_ptr.vmem [resolvable:$true] %s55_s7 }
  0x37   :  { %p1161_p11 = scmp.lt.u32.totalorder %s1157_s11, %s1374_s4 }
  0x39   :  { %p1163_p12 = pnand %p1161_p11, %p1158_p10 }
  0x3b   :  { %1166 = shalt.err (!%p1163_p12)
}
  0x3c   :  { %s1167_s16 = scalar_lea.vmem %s56_s7, 2048  ;;  %p1172_p0 = scmp.lt.s32.totalorder %s56_s7, %s56_s7 }
  0x3d   :  { %p1168_p13 = scmp.ne.s32.totalorder %s56_s7, %s1167_s16  ;;  %p1173_p1 = scmp.lt.s32.totalorder %s1167_s16, %s1167_s16 }
  0x3f   :  { %p1174_p2 = por %p1173_p1, %p1172_p0 }
  0x41   :  { %p1175_p3 = pnand %p1174_p2, %p1168_p13 }
  0x43   :  { %1178 = shalt.err (!%p1175_p3)
}
  0x44   :  { %61 = dma.hbm_to_vmem [thread:$0]  %s1374_s4, 2048, %s56_s7, [#allocation9], %s1214_s0, %s1214_s0, %s1215_s28  }
  0x45   :  { %1201 = dma.done.wait [#allocation3], 128  }
  0x46   :  { %1202 = vsyncadd [#allocation3], 4294967168 }
  0x47   :  { %1203 = dma.done.wait [#allocation6], 16384  }
  0x48   :  { %1204 = vsyncadd [#allocation6], 4294950912 }
  0x49   :  { %1205 = dma.done.wait [#allocation9], 2048  }
  0x4a   :  { %1206 = vsyncadd [#allocation9], 4294965248  ;;  %v1217_v0 = vmov 0.0   ;;  %v76_v1 = vld [vmem:[#allocation5 + $0x8] sm:$0xff]  ;;  %v83_v2 = vld [vmem:[#allocation5 + $0x40] sm:$0xff]  ;;  %vm1219_vm0 = vmmov 0  }
  0x4b   :  { %251 = vmatprep.mubr.f32.mxu0 %v1217_v0  ;;  %322 = vmatprep.mubr.f32.mxu1 %v1217_v0  ;;  %v75_v3 = vld [vmem:[#allocation5] sm:$0xff]  ;;  %v891_v4 = vpack.c.bf16 %v83_v2, %v76_v1  ;;  %v82_v5 = vld [vmem:[#allocation5 + $0x38] sm:$0xff]  ;;  %v97_v7 = vld [vmem:[#allocation5 + $0xb0] sm:$0xff] }
  0x4c   :  { %v90_v6 = vld [vmem:[#allocation5 + $0x78] sm:$0xff]  ;;  %v893_v8 = vpack.c.bf16 %v82_v5, %v75_v3  ;;  %v89_v10 = vld [vmem:[#allocation5 + $0x70] sm:$0xff]  ;;  %v96_v11 = vld [vmem:[#allocation5 + $0xa8] sm:$0xff] }
  0x4d   :  { %v895_v9 = vpack.c.bf16 %v97_v7, %v90_v6  ;;  %v104_v12 = vld [vmem:[#allocation5 + $0xe8] sm:$0xff]  ;;  %892 = vmatprep.subr.bf16.mxu0 %v891_v4  ;;  %v111_v13 = vld [vmem:[#allocation5 + $0x120] sm:$0xff]  ;;  %v897_v14 = vpack.c.bf16 %v96_v11, %v89_v10  ;;  %v110_v17 = vld [vmem:[#allocation5 + $0x118] sm:$0xff] }
  0x4e   :  { %894 = vmatpush1.bf16.msra.mxu0 %v893_v8  ;;  %v899_v15 = vpack.c.bf16 %v111_v13, %v104_v12  ;;  %v103_v16 = vld [vmem:[#allocation5 + $0xe0] sm:$0xff]  ;;  %v118_v18 = vld [vmem:[#allocation5 + $0x158] sm:$0xff]  ;;  %v125_v19 = vld [vmem:[#allocation5 + $0x190] sm:$0xff] }
  0x4f   :  { %896 = vmatprep.subr.bf16.mxu0 %v895_v9  ;;  %v901_v20 = vpack.c.bf16 %v110_v17, %v103_v16  ;;  %v903_v21 = vpack.c.bf16 %v125_v19, %v118_v18  ;;  %v117_v22 = vld [vmem:[#allocation5 + $0x150] sm:$0xff]  ;;  %v124_v23 = vld [vmem:[#allocation5 + $0x188] sm:$0xff]  ;;  %v139_v25 = vld [vmem:[#allocation5 + $0x200] sm:$0xff] }
  0x50   :  { %v132_v24 = vld [vmem:[#allocation5 + $0x1c8] sm:$0xff]  ;;  %v78_v26 = vld [vmem:[#allocation5 + $0x18] sm:$0xff]  ;;  %v85_v27 = vld [vmem:[#allocation5 + $0x50] sm:$0xff]  ;;  %v905_v32 = vpack.c.bf16 %v124_v23, %v117_v22 }
  0x51   :  { %v131_v28 = vld [vmem:[#allocation5 + $0x1c0] sm:$0xff]  ;;  %v923_v29 = vpack.c.bf16 %v85_v27, %v78_v26  ;;  %v77_v30 = vld [vmem:[#allocation5 + $0x10] sm:$0xff]  ;;  %v84_v31 = vld [vmem:[#allocation5 + $0x48] sm:$0xff]  ;;  %v907_v37 = vpack.c.bf16 %v139_v25, %v132_v24 }
  0x52   :  { %898 = vmatpush1.bf16.msra.mxu0 %v897_v14  ;;  %v138_v33 = vld [vmem:[#allocation5 + $0x1f8] sm:$0xff]  ;;  %v925_v34 = vpack.c.bf16 %v84_v31, %v77_v30  ;;  %v92_v35 = vld [vmem:[#allocation5 + $0x88] sm:$0xff]  ;;  %v99_v36 = vld [vmem:[#allocation5 + $0xc0] sm:$0xff] }
  0x53   :  { %900 = vmatprep.subr.bf16.mxu0 %v899_v15  ;;  %924 = vmatprep.subr.bf16.mxu1 %v923_v29  ;;  %v927_v38 = vpack.c.bf16 %v99_v36, %v92_v35  ;;  %v91_v39 = vld [vmem:[#allocation5 + $0x80] sm:$0xff]  ;;  %v98_v40 = vld [vmem:[#allocation5 + $0xb8] sm:$0xff]  ;;  %v153_v43 = vld [vmem:[#allocation5 + $0x270] sm:$0xff]  ;;  %v909_v49 = vpack.c.bf16 %v138_v33, %v131_v28 }
  0x54   :  { %v106_v41 = vld [vmem:[#allocation5 + $0xf8] sm:$0xff]  ;;  %926 = vmatpush1.bf16.msra.mxu1 %v925_v34  ;;  %v929_v44 = vpack.c.bf16 %v98_v40, %v91_v39  ;;  %v113_v45 = vld [vmem:[#allocation5 + $0x130] sm:$0xff]  ;;  %v112_v48 = vld [vmem:[#allocation5 + $0x128] sm:$0xff] }
  0x55   :  { %v146_v42 = vld [vmem:[#allocation5 + $0x238] sm:$0xff]  ;;  %928 = vmatprep.subr.bf16.mxu1 %v927_v38  ;;  %v931_v46 = vpack.c.bf16 %v113_v45, %v106_v41  ;;  %v105_v47 = vld [vmem:[#allocation5 + $0xf0] sm:$0xff]  ;;  %v120_v50 = vld [vmem:[#allocation5 + $0x168] sm:$0xff] }
  0x56   :  { %902 = vmatpush1.bf16.msra.mxu0 %v901_v20  ;;  %v127_v51 = vld [vmem:[#allocation5 + $0x1a0] sm:$0xff]  ;;  %v911_v52 = vpack.c.bf16 %v153_v43, %v146_v42  ;;  %v145_v53 = vld [vmem:[#allocation5 + $0x230] sm:$0xff]  ;;  %v152_v54 = vld [vmem:[#allocation5 + $0x268] sm:$0xff]  ;;  %v933_v57 = vpack.c.bf16 %v112_v48, %v105_v47 }
  0x57   :  { %904 = vmatprep.subr.bf16.mxu0 %v903_v21  ;;  %v160_v55 = vld [vmem:[#allocation5 + $0x2a8] sm:$0xff]  ;;  %v167_v56 = vld [vmem:[#allocation5 + $0x2e0] sm:$0xff]  ;;  %v935_v58 = vpack.c.bf16 %v127_v51, %v120_v50  ;;  %v126_v60 = vld [vmem:[#allocation5 + $0x198] sm:$0xff]  ;;  %v913_v61 = vpack.c.bf16 %v152_v54, %v145_v53 }
  0x58   :  { %930 = vmatpush1.bf16.msra.mxu1 %v929_v44  ;;  %v119_v59 = vld [vmem:[#allocation5 + $0x160] sm:$0xff]  ;;  %v134_v62 = vld [vmem:[#allocation5 + $0x1d8] sm:$0xff]  ;;  %v141_v63 = vld [vmem:[#allocation5 + $0x210] sm:$0xff]  ;;  %v915_v1 = vpack.c.bf16 %v167_v56, %v160_v55 }
  0x59   :  { %932 = vmatprep.subr.bf16.mxu1 %v931_v46  ;;  %v159_v2 = vld [vmem:[#allocation5 + $0x2a0] sm:$0xff]  ;;  %v166_v3 = vld [vmem:[#allocation5 + $0x2d8] sm:$0xff]  ;;  %v181_v5 = vld [vmem:[#allocation5 + $0x350] sm:$0xff]  ;;  %v937_v6 = vpack.c.bf16 %v126_v60, %v119_v59  ;;  %v939_v7 = vpack.c.bf16 %v141_v63, %v134_v62 }
  0x5a   :  { %906 = vmatpush1.bf16.msra.mxu0 %v905_v32  ;;  %v174_v4 = vld [vmem:[#allocation5 + $0x318] sm:$0xff]  ;;  %v133_v8 = vld [vmem:[#allocation5 + $0x1d0] sm:$0xff]  ;;  %v140_v9 = vld [vmem:[#allocation5 + $0x208] sm:$0xff]  ;;  %v917_v10 = vpack.c.bf16 %v166_v3, %v159_v2 }
  0x5b   :  { %908 = vmatprep.subr.bf16.mxu0 %v907_v37  ;;  %v148_v11 = vld [vmem:[#allocation5 + $0x248] sm:$0xff]  ;;  %v155_v12 = vld [vmem:[#allocation5 + $0x280] sm:$0xff]  ;;  %v919_v13 = vpack.c.bf16 %v181_v5, %v174_v4  ;;  %v173_v14 = vld [vmem:[#allocation5 + $0x310] sm:$0xff]  ;;  %v941_v16 = vpack.c.bf16 %v140_v9, %v133_v8 }
  0x5c   :  { %934 = vmatpush1.bf16.msra.mxu1 %v933_v57  ;;  %v180_v15 = vld [vmem:[#allocation5 + $0x348] sm:$0xff]  ;;  %v87_v18 = vld [vmem:[#allocation5 + $0x60] sm:$0xff]  ;;  %v943_v19 = vpack.c.bf16 %v155_v12, %v148_v11  ;;  %v154_v21 = vld [vmem:[#allocation5 + $0x278] sm:$0xff] }
  0x5d   :  { %936 = vmatprep.subr.bf16.mxu1 %v935_v58  ;;  %v80_v17 = vld [vmem:[#allocation5 + $0x28] sm:$0xff]  ;;  %v147_v20 = vld [vmem:[#allocation5 + $0x240] sm:$0xff]  ;;  %v921_v22 = vpack.c.bf16 %v180_v15, %v173_v14  ;;  %v162_v23 = vld [vmem:[#allocation5 + $0x2b8] sm:$0xff] }
  0x5e   :  { %910 = vmatpush1.bf16.msra.mxu0 %v909_v49  ;;  %v169_v24 = vld [vmem:[#allocation5 + $0x2f0] sm:$0xff]  ;;  %v955_v25 = vpack.c.bf16 %v87_v18, %v80_v17  ;;  %v79_v26 = vld [vmem:[#allocation5 + $0x20] sm:$0xff]  ;;  %v86_v27 = vld [vmem:[#allocation5 + $0x58] sm:$0xff]  ;;  %v945_v28 = vpack.c.bf16 %v154_v21, %v147_v20 }
  0x5f   :  { %912 = vmatprep.subr.bf16.mxu0 %v911_v52  ;;  %v94_v29 = vld [vmem:[#allocation5 + $0x98] sm:$0xff]  ;;  %v101_v30 = vld [vmem:[#allocation5 + $0xd0] sm:$0xff]  ;;  %v947_v31 = vpack.c.bf16 %v169_v24, %v162_v23  ;;  %v168_v33 = vld [vmem:[#allocation5 + $0x2e8] sm:$0xff]  ;;  %v957_v37 = vpack.c.bf16 %v86_v27, %v79_v26  ;;  %v1218_v23 = vmov 0.0|0.0  }
  0x60   :  { %938 = vmatpush1.bf16.msra.mxu1 %v937_v6  ;;  %v161_v32 = vld [vmem:[#allocation5 + $0x2b0] sm:$0xff]  ;;  %v1301_v34 = vld [vmem:[#allocation2] sm:$0xff]  ;;  %v176_v35 = vld [vmem:[#allocation5 + $0x328] sm:$0xff]  ;;  %v959_v38 = vpack.c.bf16 %v101_v30, %v94_v29 }
  0x61   :  { %940 = vmatprep.subr.bf16.mxu1 %v939_v7  ;;  %v183_v36 = vld [vmem:[#allocation5 + $0x360] sm:$0xff]  ;;  %v93_v39 = vld [vmem:[#allocation5 + $0x90] sm:$0xff]  ;;  %v100_v40 = vld [vmem:[#allocation5 + $0xc8] sm:$0xff]  ;;  %v949_v41 = vpack.c.bf16 %v168_v33, %v161_v32 }
  0x62   :  { %914 = vmatpush1.bf16.msra.mxu0 %v913_v61  ;;  %v108_v42 = vld [vmem:[#allocation5 + $0x108] sm:$0xff]  ;;  %v115_v43 = vld [vmem:[#allocation5 + $0x140] sm:$0xff]  ;;  %v951_v44 = vpack.c.bf16 %v183_v36, %v176_v35  ;;  %v182_v46 = vld [vmem:[#allocation5 + $0x358] sm:$0xff]  ;;  %v961_v47 = vpack.c.bf16 %v100_v40, %v93_v39 }
  0x63   :  { %916 = vmatprep.subr.bf16.mxu0 %v915_v1  ;;  %v175_v45 = vld [vmem:[#allocation5 + $0x320] sm:$0xff]  ;;  %v963_v48 = vpack.c.bf16 %v115_v43, %v108_v42  ;;  %v114_v50 = vld [vmem:[#allocation5 + $0x138] sm:$0xff]  ;;  %v129_v53 = vld [vmem:[#allocation5 + $0x1b0] sm:$0xff] }
  0x64   :  { %942 = vmatpush1.bf16.msra.mxu1 %v941_v16  ;;  %v107_v49 = vld [vmem:[#allocation5 + $0x100] sm:$0xff]  ;;  %v953_v51 = vpack.c.bf16 %v182_v46, %v175_v45  ;;  %v122_v52 = vld [vmem:[#allocation5 + $0x178] sm:$0xff]  ;;  %v121_v56 = vld [vmem:[#allocation5 + $0x170] sm:$0xff] }
  0x65   :  { %944 = vmatprep.subr.bf16.mxu1 %v943_v19  ;;  %v965_v54 = vpack.c.bf16 %v114_v50, %v107_v49  ;;  %v967_v55 = vpack.c.bf16 %v129_v53, %v122_v52  ;;  %v128_v57 = vld [vmem:[#allocation5 + $0x1a8] sm:$0xff]  ;;  %v143_v59 = vld [vmem:[#allocation5 + $0x220] sm:$0xff]  ;;  %v142_v63 = vld [vmem:[#allocation5 + $0x218] sm:$0xff] }
  0x66   :  { %918 = vmatpush1.bf16.msra.mxu0 %v917_v10  ;;  %v136_v58 = vld [vmem:[#allocation5 + $0x1e8] sm:$0xff]  ;;  %v969_v60 = vpack.c.bf16 %v128_v57, %v121_v56  ;;  %v135_v62 = vld [vmem:[#allocation5 + $0x1e0] sm:$0xff]  ;;  %v150_v1 = vld [vmem:[#allocation5 + $0x258] sm:$0xff] }
  0x67   :  { %920 = vmatprep.subr.bf16.mxu0 %v919_v13  ;;  %v971_v61 = vpack.c.bf16 %v143_v59, %v136_v58  ;;  %v157_v2 = vld [vmem:[#allocation5 + $0x290] sm:$0xff]  ;;  %v973_v3 = vpack.c.bf16 %v142_v63, %v135_v62  ;;  %v156_v6 = vld [vmem:[#allocation5 + $0x288] sm:$0xff]  ;;  %v171_v8 = vld [vmem:[#allocation5 + $0x300] sm:$0xff] }
  0x68   :  { %946 = vmatpush1.bf16.msra.mxu1 %v945_v28  ;;  %v975_v4 = vpack.c.bf16 %v157_v2, %v150_v1  ;;  %v149_v5 = vld [vmem:[#allocation5 + $0x250] sm:$0xff]  ;;  %v164_v7 = vld [vmem:[#allocation5 + $0x2c8] sm:$0xff]  ;;  %v163_v11 = vld [vmem:[#allocation5 + $0x2c0] sm:$0xff] }
  0x69   :  { %948 = vmatprep.subr.bf16.mxu1 %v947_v31  ;;  %v977_v9 = vpack.c.bf16 %v156_v6, %v149_v5  ;;  %v979_v10 = vpack.c.bf16 %v171_v8, %v164_v7  ;;  %v170_v12 = vld [vmem:[#allocation5 + $0x2f8] sm:$0xff]  ;;  %v185_v14 = vld [vmem:[#allocation5 + $0x370] sm:$0xff]  ;;  %v184_v18 = vld [vmem:[#allocation5 + $0x368] sm:$0xff] }
  0x6a   :  { %922 = vmatpush1.bf16.msra.mxu0 %v921_v22  ;;  %v178_v13 = vld [vmem:[#allocation5 + $0x338] sm:$0xff]  ;;  %v981_v15 = vpack.c.bf16 %v170_v12, %v163_v11  ;;  %v177_v17 = vld [vmem:[#allocation5 + $0x330] sm:$0xff]  ;;  %v88_v21 = vld [vmem:[#allocation5 + $0x68] sm:$0xff] }
  0x6b   :  { %956 = vmatprep.subr.bf16.mxu0 %v955_v25  ;;  %v983_v16 = vpack.c.bf16 %v185_v14, %v178_v13  ;;  %v985_v19 = vpack.c.bf16 %v184_v18, %v177_v17  ;;  %v81_v20 = vld [vmem:[#allocation5 + $0x30] sm:$0xff]  ;;  %v522_v24 = vld [vmem:[#allocation7] sm:$0xff]  ;;  %v523_v25 = vld [vmem:[#allocation7 + $0x8] sm:$0xff] }
  0x6c   :  { %950 = vmatpush1.bf16.msra.mxu1 %v949_v41  ;;  %v988_v22 = vpack.c.bf16 %v88_v21, %v81_v20  ;;  %v1012_v26 = vpack.c.bf16 %v523_v25, %v522_v24  ;;  %v95_v27 = vld [vmem:[#allocation5 + $0xa0] sm:$0xff]  ;;  %v102_v28 = vld [vmem:[#allocation5 + $0xd8] sm:$0xff]  ;;  %v524_v30 = vld [vmem:[#allocation7 + $0x10] sm:$0xff] }
  0x6d   :  { %252 = vmatmul.mubr.f32.vlgmr.msra.gmra.mrb[0].mxu0 %v1301_v34  ;;  %952 = vmatprep.subr.bf16.mxu1 %v951_v44  ;;  %v991_v29 = vpack.c.bf16 %v102_v28, %v95_v27  ;;  %v525_v31 = vld [vmem:[#allocation7 + $0x18] sm:$0xff]  ;;  %v109_v33 = vld [vmem:[#allocation5 + $0x110] sm:$0xff]  ;;  %v116_v35 = vld [vmem:[#allocation5 + $0x148] sm:$0xff] }
  0x6e   :  { %958 = vmatpush1.bf16.msra.mxu0 %v957_v37  ;;  %393 = vmatprep.mubr.f32.mxu0 %v1217_v0  ;;  %v1015_v32 = vpack.c.bf16 %v525_v31, %v524_v30  ;;  %v994_v36 = vpack.c.bf16 %v116_v35, %v109_v33  ;;  %v526_v37 = vld [vmem:[#allocation7 + $0x20] sm:$0xff]  ;;  %v130_v41 = vld [vmem:[#allocation5 + $0x1b8] sm:$0xff]  ;;  %v528_v43 = vld [vmem:[#allocation7 + $0x30] sm:$0xff] }
  0x6f   :  { %960 = vmatprep.subr.bf16.mxu0 %v959_v38  ;;  %v527_v38 = vld [vmem:[#allocation7 + $0x28] sm:$0xff]  ;;  %v123_v39 = vld [vmem:[#allocation5 + $0x180] sm:$0xff]  ;;  %v529_v44 = vld [vmem:[#allocation7 + $0x38] sm:$0xff] }
  0x70   :  { %954 = vmatpush1.bf16.msra.mxu1 %v953_v51  ;;  %v1018_v40 = vpack.c.bf16 %v527_v38, %v526_v37  ;;  %v997_v42 = vpack.c.bf16 %v130_v41, %v123_v39  ;;  %v137_v45 = vld [vmem:[#allocation5 + $0x1f0] sm:$0xff]  ;;  %v144_v46 = vld [vmem:[#allocation5 + $0x228] sm:$0xff]  ;;  %v530_v49 = vld [vmem:[#allocation7 + $0x40] sm:$0xff] }
  0x71   :  { %987 = vmatprep.subr.bf16.mxu1 %v1218_v23  ;;  %v531_v50 = vld [vmem:[#allocation7 + $0x48] sm:$0xff]  ;;  %v151_v51 = vld [vmem:[#allocation5 + $0x260] sm:$0xff]  ;;  %v158_v52 = vld [vmem:[#allocation5 + $0x298] sm:$0xff] }
  0x72   :  { %962 = vmatpush1.bf16.msra.mxu0 %v961_v47  ;;  %v1021_v47 = vpack.c.bf16 %v529_v44, %v528_v43  ;;  %v1024_v53 = vpack.c.bf16 %v531_v50, %v530_v49  ;;  %v533_v56 = vld [vmem:[#allocation7 + $0x58] sm:$0xff]  ;;  %v165_v57 = vld [vmem:[#allocation5 + $0x2d0] sm:$0xff]  ;;  %v172_v58 = vld [vmem:[#allocation5 + $0x308] sm:$0xff] }
  0x73   :  { %964 = vmatprep.subr.bf16.mxu0 %v963_v48  ;;  %323 = vmatmul.mubr.f32.vlgmr.msra.gmra.mrb[0].mxu1 %v1301_v34  ;;  %v1000_v48 = vpack.c.bf16 %v144_v46, %v137_v45  ;;  %v535_v62 = vld [vmem:[#allocation7 + $0x68] sm:$0xff]  ;;  %v179_v63 = vld [vmem:[#allocation5 + $0x340] sm:$0xff]  ;;  %v186_v1 = vld [vmem:[#allocation5 + $0x378] sm:$0xff] }
  0x74   :  { %989 = vmatpush3.bf16.msra.mxu1 %v988_v22  ;;  %818 = vmatprep.mubr.msk.f32.mxu1 %vm1219_vm0, %v1217_v0  ;;  %v537_v5 = vld [vmem:[#allocation7 + $0x78] sm:$0xff]  ;;  %v626_v50 = vld [vmem:[#allocation8 + $0x10] sm:$0xff] }
  0x75   :  { %990 = vmatprep.subr.bf16.mxu1 %v1218_v23  ;;  %v732_v22 = vld [vmem:[%s1372_s2] ss:$0 sm:$0xff] }
  0x76   :  { %966 = vmatpush1.bf16.msra.mxu0 %v965_v54  ;;  %v1003_v54 = vpack.c.bf16 %v158_v52, %v151_v51  ;;  %v627_v51 = vld [vmem:[#allocation8 + $0x18] sm:$0xff] }
  0x77   :  { %968 = vmatprep.subr.bf16.mxu0 %v967_v55  ;;  %v532_v55 = vld [vmem:[#allocation7 + $0x50] sm:$0xff]  ;;  %v1039_v52 = vpack.c.bf16 %v627_v51, %v626_v50 }
  0x78   :  { %992 = vmatpush3.bf16.msra.mxu1 %v991_v29  ;;  %v1027_v59 = vpack.c.bf16 %v533_v56, %v532_v55  ;;  %v630_v56 = vld [vmem:[#allocation8 + $0x30] sm:$0xff] }
  0x79   :  { %993 = vmatprep.subr.bf16.mxu1 %v1218_v23 }
  0x7a   :  { %970 = vmatpush1.bf16.msra.mxu0 %v969_v60  ;;  %v1006_v60 = vpack.c.bf16 %v172_v58, %v165_v57  ;;  %v631_v57 = vld [vmem:[#allocation8 + $0x38] sm:$0xff] }
  0x7b   :  { %972 = vmatprep.subr.bf16.mxu0 %v971_v61  ;;  %v534_v61 = vld [vmem:[#allocation7 + $0x60] sm:$0xff]  ;;  %v1045_v58 = vpack.c.bf16 %v631_v57, %v630_v56 }
  0x7c   :  { %995 = vmatpush3.bf16.msra.mxu1 %v994_v36  ;;  %v1030_v2 = vpack.c.bf16 %v535_v62, %v534_v61  ;;  %v634_v62 = vld [vmem:[#allocation8 + $0x50] sm:$0xff] }
  0x7d   :  { %996 = vmatprep.subr.bf16.mxu1 %v1218_v23 }
  0x7e   :  { %974 = vmatpush1.bf16.msra.mxu0 %v973_v3  ;;  %v1009_v3 = vpack.c.bf16 %v186_v1, %v179_v63  ;;  %v635_v63 = vld [vmem:[#allocation8 + $0x58] sm:$0xff] }
  0x7f   :  { %976 = vmatprep.subr.bf16.mxu0 %v975_v4  ;;  %v536_v4 = vld [vmem:[#allocation7 + $0x70] sm:$0xff]  ;;  %v1051_v1 = vpack.c.bf16 %v635_v63, %v634_v62 }
  0x80   :  { %998 = vmatpush3.bf16.msra.mxu1 %v997_v42  ;;  %v1033_v6 = vpack.c.bf16 %v537_v5, %v536_v4  ;;  %v734_v42 = vld [vmem:[%s1372_s2 + $0x1] ss:$0 sm:$0xff]  ;;  %v638_v5 = vld [vmem:[#allocation8 + $0x70] sm:$0xff]  ;;  %s1220_s2 = smov [#allocation10]  }
  0x81   :  { %999 = vmatprep.subr.bf16.mxu1 %v1218_v23  ;;  %s719_s19 = sshll.u32 %s1220_s2, 4  ;;  %s720_s19 = int_to_ptr.vmem [resolvable:$true] %s719_s19 }
  0x82   :  { %978 = vmatpush1.bf16.msra.mxu0 %v977_v9  ;;  %s1179_s20 = scalar_lea.vmem %s720_s19, 128  ;;  %p1184_p5 = scmp.lt.s32.totalorder %s720_s19, %s720_s19 }
  0x83   :  { %980 = vmatprep.subr.bf16.mxu0 %v979_v10  ;;  %p1180_p4 = scmp.ne.s32.totalorder %s720_s19, %s1179_s20  ;;  %p1185_p6 = scmp.lt.s32.totalorder %s1179_s20, %s1179_s20 }
  0x84   :  { %1001 = vmatpush3.bf16.msra.mxu1 %v1000_v48  ;;  %v625_v48 = vld [vmem:[#allocation8 + $0x8] sm:$0xff] }
  0x85   :  { %1002 = vmatprep.subr.bf16.mxu1 %v1218_v23  ;;  %p1186_p7 = por %p1185_p6, %p1184_p5 }
  0x86   :  { %982 = vmatpush1.bf16.msra.mxu0 %v981_v15 }
  0x87   :  { %984 = vmatprep.subr.bf16.mxu0 %v983_v16  ;;  %p1187_p8 = pnand %p1186_p7, %p1180_p4 }
  0x88   :  { %1004 = vmatpush3.bf16.msra.mxu1 %v1003_v54  ;;  %v629_v54 = vld [vmem:[#allocation8 + $0x28] sm:$0xff] }
  0x89   :  { %1005 = vmatprep.subr.bf16.mxu1 %v1218_v23 }
  0x8a   :  { %986 = vmatpush1.bf16.msra.mxu0 %v985_v19 }
  0x8b   :  { %1011 = vmatprep.subr.bf16.mxu0 %v1218_v23 }
  0x8c   :  { %1007 = vmatpush3.bf16.msra.mxu1 %v1006_v60  ;;  %v633_v60 = vld [vmem:[#allocation8 + $0x48] sm:$0xff] }
  0x8d   :  { %394 = vmatmul.mubr.f32.vlgmr.msra.gmra.mrb[2].mxu0 %v1301_v34  ;;  %1008 = vmatprep.subr.bf16.mxu1 %v1218_v23 }
  0x8e   :  { %1013 = vmatpush3.bf16.msra.mxu0 %v1012_v26  ;;  %853 = vmatprep.mubr.msk.f32.mxu0 %vm1219_vm0, %v1217_v0 }
  0x8f   :  { %1014 = vmatprep.subr.bf16.mxu0 %v1218_v23 }
  0x90   :  { %1010 = vmatpush3.bf16.msra.mxu1 %v1009_v3  ;;  %v637_v3 = vld [vmem:[#allocation8 + $0x68] sm:$0xff] }
  0x91   :  { %1035 = vmatprep.subr.bf16.mxu1 %v1218_v23 }
  0x92   :  { %1016 = vmatpush3.bf16.msra.mxu0 %v1015_v32 }
  0x93   :  { %1017 = vmatprep.subr.bf16.mxu0 %v1218_v23  ;;  %819 = vmatmul.mubr.f32.vlgmr.msra.gmra.mrb[2].mxu1 %v1301_v34 }
  0x94   :  { %888 = vmatprep.mubr.msk.f32.mxu1 %vm1219_vm0, %v1217_v0 }
  0x96   :  { %1019 = vmatpush3.bf16.msra.mxu0 %v1018_v40 }
  0x97   :  { %1020 = vmatprep.subr.bf16.mxu0 %v1218_v23 }
  0x9a   :  { %1022 = vmatpush3.bf16.msra.mxu0 %v1021_v47  ;;  %v624_v47 = vld [vmem:[#allocation8] sm:$0xff] }
  0x9b   :  { %1023 = vmatprep.subr.bf16.mxu0 %v1218_v23  ;;  %v1036_v49 = vpack.c.bf16 %v625_v48, %v624_v47 }
  0x9d   :  { %1037 = vmatpush3.bf16.msra.mxu1 %v1036_v49 }
  0x9e   :  { %1025 = vmatpush3.bf16.msra.mxu0 %v1024_v53  ;;  %1038 = vmatprep.subr.bf16.mxu1 %v1218_v23  ;;  %v628_v53 = vld [vmem:[#allocation8 + $0x20] sm:$0xff] }
  0x9f   :  { %1026 = vmatprep.subr.bf16.mxu0 %v1218_v23  ;;  %v1042_v55 = vpack.c.bf16 %v629_v54, %v628_v53 }
  0xa1   :  { %1040 = vmatpush3.bf16.msra.mxu1 %v1039_v52 }
  0xa2   :  { %1028 = vmatpush3.bf16.msra.mxu0 %v1027_v59  ;;  %1041 = vmatprep.subr.bf16.mxu1 %v1218_v23  ;;  %v632_v59 = vld [vmem:[#allocation8 + $0x40] sm:$0xff] }
  0xa3   :  { %1029 = vmatprep.subr.bf16.mxu0 %v1218_v23  ;;  %v1048_v61 = vpack.c.bf16 %v633_v60, %v632_v59 }
  0xa5   :  { %1043 = vmatpush3.bf16.msra.mxu1 %v1042_v55 }
  0xa6   :  { %1031 = vmatpush3.bf16.msra.mxu0 %v1030_v2  ;;  %1044 = vmatprep.subr.bf16.mxu1 %v1218_v23  ;;  %v636_v2 = vld [vmem:[#allocation8 + $0x60] sm:$0xff] }
  0xa7   :  { %1032 = vmatprep.subr.bf16.mxu0 %v1218_v23  ;;  %v1054_v4 = vpack.c.bf16 %v637_v3, %v636_v2 }
  0xa9   :  { %1046 = vmatpush3.bf16.msra.mxu1 %v1045_v58 }
  0xaa   :  { %1034 = vmatpush3.bf16.msra.mxu0 %v1033_v6  ;;  %1047 = vmatprep.subr.bf16.mxu1 %v1218_v23  ;;  %v639_v6 = vld [vmem:[#allocation8 + $0x78] sm:$0xff] }
  0xad   :  { %1049 = vmatpush3.bf16.msra.mxu1 %v1048_v61 }
  0xae   :  { %1050 = vmatprep.subr.bf16.mxu1 %v1218_v23 }
  0xb1   :  { %1052 = vmatpush3.bf16.msra.mxu1 %v1051_v1 }
  0xb2   :  { %1053 = vmatprep.subr.bf16.mxu1 %v1218_v23 }
  0xb5   :  { %1055 = vmatpush3.bf16.msra.mxu1 %v1054_v4 }
  0xb6   :  { %1056 = vmatprep.subr.bf16.mxu1 %v1218_v23 }
 0x140   :  { %v253_v7 = vpop.f32.mrb[0].mxu0 }
 0x141   :  { %v255_v8 = vpop.f32.mrb[1].mxu0 }
 0x142   :  { %v730_v9 = vmul.f32 -1.442695, %v255_v8 }
 0x144   :  { %1071 = vpow2.f32 %v730_v9 }
 0x146   :  { %v324_v10 = vpop.f32.mrb[0].mxu1 }
 0x147   :  { %v326_v11 = vpop.f32.mrb[1].mxu1 }
 0x148   :  { %v731_v12 = vmul.f32 -1.442695, %v326_v11 }
 0x14a   :  { %1073 = vpow2.f32 %v731_v12 }
 0x14e   :  { %v1072_v13 = vpop.eup %1071 }
 0x14f   :  { %v473_v14 = vadd.f32 1.0, %v1072_v13 }
 0x151   :  { %1075 = vrcp.f32 %v473_v14 }
 0x154   :  { %v1074_v15 = vpop.eup %1073 }
 0x155   :  { %v479_v16 = vadd.f32 1.0, %v1074_v15 }
 0x157   :  { %1077 = vrcp.f32 %v479_v16 }
 0x15b   :  { %v1076_v17 = vpop.eup %1075 }
 0x15c   :  { %v506_v34 = vmul.f32 %v1076_v17, %v253_v7  ;;  %v1057_v7 = vpack.c.bf16 %v639_v6, %v638_v5 }
 0x15e   :  { %v507_v18 = vadd.f32 %v506_v34, %v324_v10  ;;  %1058 = vmatpush3.bf16.msra.mxu1 %v1057_v7 }
 0x160   :  { %v509_v19 = vmin.f32 %v507_v18, 20.0  ;;  %v395_v20 = vpop.f32.mrb[2].mxu0  ;;  %vm508_vm2 = vcmp.gt.f32.partialorder %v507_v18, 20.0 }
 0x161   :  { %v397_v0 = vpop.f32.mrb[3].mxu0  ;;  %v1334_v24 = vpop.eup %1077 }
 0x162   :  { %v510_v21 = vmul.f32 1.442695, %v509_v19  ;;  %v489_v25 = vmul.f32 %v1334_v24, %v732_v22  ;;  %v733_v38 = vmul.f32 -1.442695, %v397_v0 }
 0x164   :  { %1079 = vpow2.f32 %v510_v21  ;;  %v1337_v26 = vadd.f32 %v489_v25, %v395_v20 }
 0x166   :  { %v466_v44 = vpop.f32.mrb[2].mxu1 }
 0x167   :  { %v820_v46 = vpop.f32.mrb[3].mxu1 }
 0x16e   :  { %v1080_v27 = vpop.eup %1079 }
 0x16f   :  { %v512_v28 = vadd.f32 1.0, %v1080_v27  ;;  %v515_v29 = vmul.f32 -0.5, %v1080_v27  ;;  %v518_v31 = vand.u32 2147483647, %v1080_v27 }
 0x171   :  { %1081 = vlog2.f32 %v512_v28  ;;  %v516_v30 = vadd.f32 1.0, %v515_v29  ;;  %vm519_vm1 = vcmp.lt.f32.partialorder %v518_v31, 0.0004427343 }
 0x172   :  { %1083 = vpow2.f32 %v733_v38 }
 0x173   :  { %v517_v35 = vmul.f32 %v1080_v27, %v516_v30 }
 0x17b   :  { %v1082_v32 = vpop.eup %1081 }
 0x17c   :  { %v514_v33 = vmul.f32 0.6931472, %v1082_v32  ;;  %v1084_v39 = vpop.eup %1083 }
 0x17d   :  { %v494_v40 = vadd.f32 1.0, %v1084_v39 }
 0x17e   :  { %v520_v36 = vsel %vm519_vm1, %v517_v35, %v514_v33 }
 0x17f   :  { %v521_v37 = vsel %vm508_vm2, %v507_v18, %v520_v36  ;;  %1085 = vrcp.f32 %v494_v40 }
 0x180   :  { %854 = vmatmul.mubr.f32.vlgmr.msra.gmra.mrb[4].mxu0 %v521_v37 }
 0x189   :  { %v1339_v41 = vpop.eup %1085 }
 0x18a   :  { %v504_v43 = vmul.f32 %v1339_v41, %v734_v42 }
 0x18c   :  { %v1345_v45 = vadd.f32 %v504_v43, %v466_v44 }
 0x253   :  { %v604_v8 = vpop.f32.mrb[4].mxu0 }
 0x254   :  { %v608_v9 = vmul.f32 %v1334_v24, %v604_v8  ;;  %v855_v10 = vpop.f32.mrb[5].mxu0 }
 0x256   :  { %v609_v11 = vadd.f32 %v608_v9, %v1337_v26 }
 0x258   :  { %v611_v12 = vmin.f32 %v609_v11, 20.0  ;;  %vm610_vm4 = vcmp.gt.f32.partialorder %v609_v11, 20.0 }
 0x25a   :  { %v612_v13 = vmul.f32 1.442695, %v611_v12 }
 0x25c   :  { %1087 = vpow2.f32 %v612_v13 }
 0x266   :  { %v1088_v14 = vpop.eup %1087 }
 0x267   :  { %v614_v15 = vadd.f32 1.0, %v1088_v14  ;;  %v617_v16 = vmul.f32 -0.5, %v1088_v14  ;;  %v620_v34 = vand.u32 2147483647, %v1088_v14 }
 0x269   :  { %1089 = vlog2.f32 %v614_v15  ;;  %v618_v17 = vadd.f32 1.0, %v617_v16  ;;  %vm621_vm3 = vcmp.lt.f32.partialorder %v620_v34, 0.0004427343 }
 0x26b   :  { %v619_v20 = vmul.f32 %v1088_v14, %v618_v17 }
 0x273   :  { %v1090_v18 = vpop.eup %1089 }
 0x274   :  { %v616_v19 = vmul.f32 0.6931472, %v1090_v18 }
 0x276   :  { %v622_v23 = vsel %vm621_vm3, %v619_v20, %v616_v19 }
 0x277   :  { %v623_v0 = vsel %vm610_vm4, %v609_v11, %v622_v23 }
 0x278   :  { %889 = vmatmul.mubr.f32.vlgmr.msra.gmra.mrb[4].mxu1 %v623_v0 }
 0x34b   :  { %v706_v21 = vpop.f32.mrb[4].mxu1 }
 0x34c   :  { %v710_v22 = vmul.f32 %v1339_v41, %v706_v21  ;;  %v890_v24 = vpop.f32.mrb[5].mxu1 }
 0x34e   :  { %v711_v25 = vadd.f32 %v710_v22, %v1345_v45 }
 0x350   :  { %712 = vst [vmem:[#allocation10] sm:$0xff] %v711_v25 }
 0x351   :  { %1190 = shalt.err (!%p1187_p8)
}
 0x352   :  { %s1191_s23 = scalar_lea.hbm %s1375_s5, 128 }
 0x353   :  { %p1192_p9 = scmp.ne.s32.totalorder %s1375_s5, %s1191_s23  ;;  %p1195_p10 = scmp.lt.u32.totalorder %s1191_s23, %s1375_s5 }
 0x355   :  { %p1197_p11 = pnand %p1195_p10, %p1192_p9 }
 0x357   :  { %1200 = shalt.err (!%p1197_p11)
}
 0x358   :  { %722 = dma.vmem_to_hbm [thread:$0]  %s720_s19, 128, %s1375_s5, [#allocation4]  }
 0x359   :  { %1207 = dma.done.wait [#allocation4], 128  }
 0x35a   :  { %1208 = vsyncadd [#allocation4], 4294967168 }
 0x35b   :  { %726 = vsyncpa [#allocation3], 1 }
 0x35c   :  { %727 = vsyncpa [#allocation6], 1 }
 0x35d   :  { %728 = vsyncpa [#allocation9], 1 }
 0x35e   :  { %729 = vsyncpa [#allocation4], 1 }

</bundles_post_ra>
